<compile_context>
chip_gen: v5e
topology: v5e:2x2
jax: 0.10.0
libtpu: 0.0.40
codegen_flags: <defaults>
</compile_context>

<pallas_src>
import math

import jax
import jax.numpy as jnp
from jax.experimental import pallas as pl
from jax.experimental.pallas import tpu as pltpu

STEPS_PER_DAY = 288
TOD_EMB_DIM = 16
DOW_EMB_DIM = 16
OUT_DIM = TOD_EMB_DIM + DOW_EMB_DIM            # 32
ONEHOT_DIM = 384                               # 288 tod rows + 96 pad/dow rows = 3*128
ROWS_PER_LANE_GROUP = 4                        # 4 * 32 = 128 output lanes


def time_embedding_kernel(idx_ref, table_ref, out_ref):
    """idx_ref: (tm4, 8) int32   -- [tod(4r), 288+dow(4r), tod(4r+1), ...]
       table_ref: (384, 32) f32  -- fused block-diagonal embedding table
       out_ref: (tm4, 128) f32   -- 4 consecutive 32-dim embeddings per row."""
    tm4 = idx_ref.shape[0]
    idx = idx_ref[...]                                      # (tm4, 8)
    tab = table_ref[...]                                    # (384, 32)
    iota = jax.lax.broadcasted_iota(jnp.int32, (tm4, ONEHOT_DIM), 1)

    parts = []
    for k in range(ROWS_PER_LANE_GROUP):                    # short fixed unroll
        tod_i = idx[:, 2 * k:2 * k + 1]                     # (tm4, 1)
        dow_i = idx[:, 2 * k + 1:2 * k + 2]                 # (tm4, 1)
        # exactly two ones per row (tod row < 288, dow row >= 288, never equal)
        onehot = ((iota == tod_i) | (iota == dow_i)).astype(jnp.float32)
        parts.append(jnp.dot(onehot, tab,
                             preferred_element_type=jnp.float32))  # (tm4, 32)

    out_ref[...] = jnp.concatenate(parts, axis=-1).astype(out_ref.dtype)


def time_embedding(tod, dow, tod_table, dow_table, *, tile_m=1024):
    """tod, dow: (...,) float arrays (same shape).  Returns (..., 32) float32."""
    assert tod.shape == dow.shape
    batch_shape = tod.shape
    M = int(math.prod(batch_shape)) if batch_shape else 1

    # Pick the largest tile <= tile_m that the problem actually fills; keep it a
    # multiple of 128 so M maps cleanly onto the MXU / (8,128) vreg tiling and so
    # large problems keep a multi-step "parallel" grid (megacore sharding).
    tm = max(128, tile_m - tile_m % 128)
    while tm > 128 and M <= tm // 2:
        tm //= 2
    M_pad = ((M + tm - 1) // tm) * tm

    # Single fused int32 index stream: col 0 = tod row, col 1 = 288 + dow row.
    # (x * 288).astype(int32) matches torch .long() truncation for x >= 0.
    tod_idx = (tod.reshape(-1).astype(jnp.float32) * STEPS_PER_DAY).astype(jnp.int32)
    dow_idx = dow.reshape(-1).astype(jnp.int32) + STEPS_PER_DAY
    idx = jnp.stack([tod_idx, dow_idx], axis=-1)            # (M, 2)
    if M_pad != M:
        idx = jnp.pad(idx, ((0, M_pad - M), (0, 0)))        # pad rows sliced off below
    idx = idx.reshape(M_pad // ROWS_PER_LANE_GROUP, 2 * ROWS_PER_LANE_GROUP)

    # Fused block-diagonal table (built once; tiny).
    table = jnp.zeros((ONEHOT_DIM, OUT_DIM), jnp.float32)
    table = table.at[:STEPS_PER_DAY, :TOD_EMB_DIM].set(tod_table.astype(jnp.float32))
    table = table.at[STEPS_PER_DAY:STEPS_PER_DAY + 7, TOD_EMB_DIM:].set(
        dow_table.astype(jnp.float32))

    tm4 = tm // ROWS_PER_LANE_GROUP
    lane_w = ROWS_PER_LANE_GROUP * OUT_DIM                  # 128
    grid = (M_pad // tm,)

    out = pl.pallas_call(
        time_embedding_kernel,
        out_shape=jax.ShapeDtypeStruct((M_pad // ROWS_PER_LANE_GROUP, lane_w),
                                       jnp.float32),
        grid_spec=pltpu.PrefetchScalarGridSpec(
            num_scalar_prefetch=0,
            grid=grid,
            in_specs=[
                pl.BlockSpec((tm4, 2 * ROWS_PER_LANE_GROUP), lambda i: (i, 0)),
                pl.BlockSpec((ONEHOT_DIM, OUT_DIM), lambda i: (0, 0)),
            ],
            out_specs=pl.BlockSpec((tm4, lane_w), lambda i: (i, 0)),
        ),
        compiler_params=pltpu.CompilerParams(
            dimension_semantics=("parallel",)),
    )(idx, table)

    out = out.reshape(M_pad, OUT_DIM)                       # free row-major reshape
    if M_pad != M:
        out = out[:M]
    return out.reshape(*batch_shape, OUT_DIM)


def time_embedding_ref(tod, dow, tod_table, dow_table):
    """Plain-JAX reference matching the PyTorch forward."""
    tod_idx = (tod * STEPS_PER_DAY).astype(jnp.int32)
    dow_idx = dow.astype(jnp.int32)
    tod_emb = jnp.take(tod_table, tod_idx, axis=0)
    dow_emb = jnp.take(dow_table, dow_idx, axis=0)
    return jnp.concatenate([tod_emb, dow_emb], axis=-1)


if __name__ == "__main__":
    key = jax.random.PRNGKey(0)
    k_tod, k_dow, k_wt, k_wd, k_tod2, k_dow2 = jax.random.split(key, 6)

    # deterministic parameter init (nn.Embedding default: N(0, 1))
    tod_table = jax.random.normal(k_wt, (STEPS_PER_DAY, TOD_EMB_DIM), dtype=jnp.float32)
    dow_table = jax.random.normal(k_wd, (7, DOW_EMB_DIM), dtype=jnp.float32)

    # small shapes: batch=2, seq=8, nodes=4
    B, T, N = 2, 8, 4
    tod = jax.random.uniform(k_tod, (B, T, N), dtype=jnp.float32)         # in [0, 1)
    dow = jax.random.randint(k_dow, (B, T, N), 0, 7).astype(jnp.float32)  # in {0..6}

    out = jax.block_until_ready(time_embedding(tod, dow, tod_table, dow_table))
    ref = time_embedding_ref(tod, dow, tod_table, dow_table)
    assert out.shape == (B, T, N, OUT_DIM), out.shape
    assert jnp.allclose(out, ref, atol=1e-5, rtol=1e-5), "mismatch vs reference"

    # ragged / padding path (M not a multiple of 4 or the tile)
    B2, T2, N2 = 3, 5, 7
    tod2 = jax.random.uniform(k_tod2, (B2, T2, N2), dtype=jnp.float32)
    dow2 = jax.random.randint(k_dow2, (B2, T2, N2), 0, 7).astype(jnp.float32)
    out2 = jax.block_until_ready(time_embedding(tod2, dow2, tod_table, dow_table))
    ref2 = time_embedding_ref(tod2, dow2, tod_table, dow_table)
    assert out2.shape == (B2, T2, N2, OUT_DIM), out2.shape
    assert jnp.allclose(out2, ref2, atol=1e-5, rtol=1e-5), "mismatch vs reference (ragged)"

    print("KERNEL_OK")
</pallas_src>

<mosaic_0001>
module attributes {stable_mosaic.version = 11 : i64} {
  func.func @time_embedding_kernel(%arg0: i32, %arg1: memref<32x8xi32, #tpu.memory_space<vmem>>, %arg2: memref<384x32xf32, #tpu.memory_space<vmem>>, %arg3: memref<32x128xf32, #tpu.memory_space<vmem>>) attributes {dimension_semantics = [#tpu.dimension_semantics<parallel>], iteration_bounds = array<i64: 1>, scalar_prefetch = 0 : i64, scratch_operands = 0 : i64, tpu.core_type = #tpu.core_type<tc>, window_params = [{transform_indices = @transform_0, window_bounds = array<i64: 32, 8>}, {pipeline_mode = #tpu.pipeline_mode<synchronous>, transform_indices = @transform_1, window_bounds = array<i64: 384, 32>}, {transform_indices = @transform_2, window_bounds = array<i64: 32, 128>}]} {
    %c0 = arith.constant 0 : index
    %c0_0 = arith.constant 0 : index
    %0 = vector.load %arg1[%c0, %c0_0] : memref<32x8xi32, #tpu.memory_space<vmem>>, vector<32x8xi32>
    %c0_1 = arith.constant 0 : index
    %c0_2 = arith.constant 0 : index
    %1 = vector.load %arg2[%c0_1, %c0_2] : memref<384x32xf32, #tpu.memory_space<vmem>>, vector<384x32xf32>
    %2 = tpu.iota {dimensions = array<i32: 1>} : vector<32x384xi32>
    %3 = vector.extract_strided_slice %0 {offsets = [0, 0], sizes = [32, 1], strides = [1, 1]} : vector<32x8xi32> to vector<32x1xi32>
    %4 = vector.extract_strided_slice %0 {offsets = [0, 1], sizes = [32, 1], strides = [1, 1]} : vector<32x8xi32> to vector<32x1xi32>
    %5 = vector.broadcast %3 : vector<32x1xi32> to vector<32x384xi32>
    %6 = arith.cmpi eq, %2, %5 : vector<32x384xi32>
    %7 = vector.broadcast %4 : vector<32x1xi32> to vector<32x384xi32>
    %8 = arith.cmpi eq, %2, %7 : vector<32x384xi32>
    %9 = arith.ori %6, %8 : vector<32x384xi1>
    %10 = arith.extui %9 : vector<32x384xi1> to vector<32x384xi32>
    %11 = arith.sitofp %10 : vector<32x384xi32> to vector<32x384xf32>
    %cst = arith.constant dense<0.000000e+00> : vector<32x32xf32>
    %12 = tpu.matmul %11, %1, %cst {dimension_numbers = #tpu.dot_dimension_numbers<[1], [0], [0], [1], [0, 0, 1, 1], [], []>} : vector<32x384xf32>, vector<384x32xf32>, vector<32x32xf32> -> vector<32x32xf32>
    %13 = vector.extract_strided_slice %0 {offsets = [0, 2], sizes = [32, 1], strides = [1, 1]} : vector<32x8xi32> to vector<32x1xi32>
    %14 = vector.extract_strided_slice %0 {offsets = [0, 3], sizes = [32, 1], strides = [1, 1]} : vector<32x8xi32> to vector<32x1xi32>
    %15 = vector.broadcast %13 : vector<32x1xi32> to vector<32x384xi32>
    %16 = arith.cmpi eq, %2, %15 : vector<32x384xi32>
    %17 = vector.broadcast %14 : vector<32x1xi32> to vector<32x384xi32>
    %18 = arith.cmpi eq, %2, %17 : vector<32x384xi32>
    %19 = arith.ori %16, %18 : vector<32x384xi1>
    %20 = arith.extui %19 : vector<32x384xi1> to vector<32x384xi32>
    %21 = arith.sitofp %20 : vector<32x384xi32> to vector<32x384xf32>
    %cst_3 = arith.constant dense<0.000000e+00> : vector<32x32xf32>
    %22 = tpu.matmul %21, %1, %cst_3 {dimension_numbers = #tpu.dot_dimension_numbers<[1], [0], [0], [1], [0, 0, 1, 1], [], []>} : vector<32x384xf32>, vector<384x32xf32>, vector<32x32xf32> -> vector<32x32xf32>
    %23 = vector.extract_strided_slice %0 {offsets = [0, 4], sizes = [32, 1], strides = [1, 1]} : vector<32x8xi32> to vector<32x1xi32>
    %24 = vector.extract_strided_slice %0 {offsets = [0, 5], sizes = [32, 1], strides = [1, 1]} : vector<32x8xi32> to vector<32x1xi32>
    %25 = vector.broadcast %23 : vector<32x1xi32> to vector<32x384xi32>
    %26 = arith.cmpi eq, %2, %25 : vector<32x384xi32>
    %27 = vector.broadcast %24 : vector<32x1xi32> to vector<32x384xi32>
    %28 = arith.cmpi eq, %2, %27 : vector<32x384xi32>
    %29 = arith.ori %26, %28 : vector<32x384xi1>
    %30 = arith.extui %29 : vector<32x384xi1> to vector<32x384xi32>
    %31 = arith.sitofp %30 : vector<32x384xi32> to vector<32x384xf32>
    %cst_4 = arith.constant dense<0.000000e+00> : vector<32x32xf32>
    %32 = tpu.matmul %31, %1, %cst_4 {dimension_numbers = #tpu.dot_dimension_numbers<[1], [0], [0], [1], [0, 0, 1, 1], [], []>} : vector<32x384xf32>, vector<384x32xf32>, vector<32x32xf32> -> vector<32x32xf32>
    %33 = vector.extract_strided_slice %0 {offsets = [0, 6], sizes = [32, 1], strides = [1, 1]} : vector<32x8xi32> to vector<32x1xi32>
    %34 = vector.extract_strided_slice %0 {offsets = [0, 7], sizes = [32, 1], strides = [1, 1]} : vector<32x8xi32> to vector<32x1xi32>
    %35 = vector.broadcast %33 : vector<32x1xi32> to vector<32x384xi32>
    %36 = arith.cmpi eq, %2, %35 : vector<32x384xi32>
    %37 = vector.broadcast %34 : vector<32x1xi32> to vector<32x384xi32>
    %38 = arith.cmpi eq, %2, %37 : vector<32x384xi32>
    %39 = arith.ori %36, %38 : vector<32x384xi1>
    %40 = arith.extui %39 : vector<32x384xi1> to vector<32x384xi32>
    %41 = arith.sitofp %40 : vector<32x384xi32> to vector<32x384xf32>
    %cst_5 = arith.constant dense<0.000000e+00> : vector<32x32xf32>
    %42 = tpu.matmul %41, %1, %cst_5 {dimension_numbers = #tpu.dot_dimension_numbers<[1], [0], [0], [1], [0, 0, 1, 1], [], []>} : vector<32x384xf32>, vector<384x32xf32>, vector<32x32xf32> -> vector<32x32xf32>
    %43 = tpu.concatenate %12, %22, %32, %42 in 1 : vector<32x32xf32>, vector<32x32xf32>, vector<32x32xf32>, vector<32x32xf32> -> vector<32x128xf32>
    %c0_6 = arith.constant 0 : index
    %c0_7 = arith.constant 0 : index
    %44 = vector.load %arg3[%c0_6, %c0_7] : memref<32x128xf32, #tpu.memory_space<vmem>>, vector<32x128xf32>
    tpu.vector_store %arg3[%c0_6, %c0_7], %43 {strides = array<i32>} : memref<32x128xf32, #tpu.memory_space<vmem>>, vector<32x128xf32>,
    return
  }
  func.func @transform_0(%arg0: i32) -> (i32, i32) {
    %c0_i32 = arith.constant 0 : i32
    %c0_i32_0 = arith.constant 0 : i32
    return %arg0, %c0_i32 : i32, i32
  }
  func.func @transform_1(%arg0: i32) -> (i32, i32) {
    %c0_i32 = arith.constant 0 : i32
    %c0_i32_0 = arith.constant 0 : i32
    %c0_i32_1 = arith.constant 0 : i32
    return %c0_i32, %c0_i32_0 : i32, i32
  }
  func.func @transform_2(%arg0: i32) -> (i32, i32) {
    %c0_i32 = arith.constant 0 : i32
    %c0_i32_0 = arith.constant 0 : i32
    return %arg0, %c0_i32 : i32, i32
  }
}

</mosaic_0001>

<bundles_post_ra>
// kernel: tpu_custom_call.1
= control target key start
LH: loop header
LB: loop body
LE: loop exit
PB: predicated region body
PF: predicated region fallthrough
CT: control target
= control target key end

     0   :  { %v1001_v1 = vmov 2   ;;  %v1002_v2 = vmov 1   ;;  %s1775_s0 = inlined_call_operand.vmem [shape: s32[32,8], index: 0, kind: input, shape index: {}]   ;;  %s1776_s1 = inlined_call_operand.vmem [shape: f32[384,32], index: 1, kind: input, shape index: {}]   ;;  %s1777_s2 = inlined_call_operand.hbm [shape: f32[32,128], index: 2, kind: output, shape index: {}]  }
   0x1   :  { %v1034_v0 = vld [vmem:[%s1775_s0] sm:$0xff]  ;;  %950 = vset.pattern.permute.xlu1 %v1001_v1  ;;  %948 = vset.pattern.permute.xlu0 %v1002_v2  ;;  %v1039_v3 = vld [vmem:[%s1775_s0 + $0x8] sm:$0xff] }
   0x2   :  { %7 = vsyncpa [#allocation3], 0  ;;  %240 = vperm.xlu1 %950, %v1034_v0   ;;  %93 = vperm.xlu0 %948, %v1034_v0   ;;  %v1003_v4 = vmov 0   ;;  %v1004_v5 = vmov 3   ;;  %v1050_v6 = vld [vmem:[%s1775_s0 + $0x10] sm:$0xff]  ;;  %v1058_v7 = vld [vmem:[%s1775_s0 + $0x18] sm:$0xff]  ;;  %v64_v62 = vlaneseq }
   0x3   :  { %952 = vset.pattern.permute.xlu2 %v1003_v4  ;;  %v1005_v8 = vmov 4   ;;  %v1006_v9 = vmov 5   ;;  %v1007_v10 = vmov 6   ;;  %v1076_v11 = vld [vmem:[%s1776_s1 + $0x78] sm:$0xff]  ;;  %v1008_v14 = vmov 7   ;;  %v1097_v15 = vld [vmem:[%s1776_s1 + $0x70] sm:$0xff] }
   0x4   :  { %72 = vperm.xlu2 %952, %v1039_v3   ;;  %v1081_v12 = vld [vmem:[%s1776_s1 + $0xf8] sm:$0xff]  ;;  %152 = vmatpush.msra.mxu0 %v1076_v11  ;;  %v1102_v16 = vld [vmem:[%s1776_s1 + $0xf0] sm:$0xff]  ;;  %v1114_v18 = vld [vmem:[%s1776_s1 + $0x68] sm:$0xff]  ;;  %s1011_s25 = smov 64   ;;  %s1012_s26 = smov 96  }
   0x5   :  { %v1086_v13 = vld [vmem:[%s1776_s1 + $0x178] sm:$0xff]  ;;  %181 = vmatpush.msra.mxu1 %v1081_v12  ;;  %323 = vmatpush.msra.mxu3 %v1076_v11  ;;  %v1107_v17 = vld [vmem:[%s1776_s1 + $0x170] sm:$0xff]  ;;  %v1119_v19 = vld [vmem:[%s1776_s1 + $0xe8] sm:$0xff]  ;;  %s1013_s27 = smov [#allocation2]   ;;  %s825_s3 = sshll.u32 %s1777_s2, 4  ;;  %s826_s3 = int_to_ptr.hbm [resolvable:$true] %s825_s3 }
   0x6   :  { %210 = vmatpush.msra.mxu2 %v1086_v13  ;;  %153 = vmatpush.msra.mxu0 %v1097_v15  ;;  %v1124_v20 = vld [vmem:[%s1776_s1 + $0x168] sm:$0xff]  ;;  %v1131_v21 = vld [vmem:[%s1776_s1 + $0x60] sm:$0xff]  ;;  %v1152_v24 = vld [vmem:[%s1776_s1 + $0x58] sm:$0xff]  ;;  %s823_s28 = sshll.u32 %s1013_s27, 4  ;;  %s1014_s4 = smov 128   ;;  %s824_s28 = int_to_ptr.vmem [resolvable:$true] %s823_s28 }
   0x7   :  { %182 = vmatpush.msra.mxu1 %v1102_v16  ;;  %324 = vmatpush.msra.mxu3 %v1097_v15  ;;  %v1138_v22 = vld [vmem:[%s1776_s1 + $0xe0] sm:$0xff]  ;;  %v1157_v25 = vld [vmem:[%s1776_s1 + $0xd8] sm:$0xff]  ;;  %v1171_v27 = vld [vmem:[%s1776_s1 + $0x50] sm:$0xff]  ;;  %s1015_s5 = smov 8  }
   0x8   :  { %211 = vmatpush.msra.mxu2 %v1107_v17  ;;  %154 = vmatpush.msra.mxu0 %v1114_v18  ;;  %v1143_v23 = vld [vmem:[%s1776_s1 + $0x160] sm:$0xff]  ;;  %v1164_v26 = vld [vmem:[%s1776_s1 + $0x158] sm:$0xff]  ;;  %v1178_v28 = vld [vmem:[%s1776_s1 + $0xd0] sm:$0xff] }
   0x9   :  { %183 = vmatpush.msra.mxu1 %v1119_v19  ;;  %325 = vmatpush.msra.mxu3 %v1114_v18  ;;  %v1183_v29 = vld [vmem:[%s1776_s1 + $0x150] sm:$0xff]  ;;  %v1190_v30 = vld [vmem:[%s1776_s1 + $0x48] sm:$0xff]  ;;  %v1209_v33 = vld [vmem:[%s1776_s1 + $0x40] sm:$0xff] }
   0xa   :  { %951 = vset.pattern.permute.xlu1 %v1004_v5  ;;  %949 = vset.pattern.permute.xlu0 %v1003_v4  ;;  %v1197_v31 = vld [vmem:[%s1776_s1 + $0xc8] sm:$0xff]  ;;  %v1216_v34 = vld [vmem:[%s1776_s1 + $0xc0] sm:$0xff]  ;;  %v1232_v36 = vld [vmem:[%s1776_s1 + $0x38] sm:$0xff] }
   0xb   :  { %264 = vperm.xlu1 %951, %v1034_v0   ;;  %69 = vperm.xlu0 %949, %v1034_v0   ;;  %v1202_v32 = vld [vmem:[%s1776_s1 + $0x148] sm:$0xff]  ;;  %v1223_v35 = vld [vmem:[%s1776_s1 + $0x140] sm:$0xff]  ;;  %v1239_v37 = vld [vmem:[%s1776_s1 + $0xb8] sm:$0xff] }
   0xc   :  { %953 = vset.pattern.permute.xlu2 %v1002_v2  ;;  %212 = vmatpush.msra.mxu2 %v1124_v20  ;;  %v1244_v38 = vld [vmem:[%s1776_s1 + $0x138] sm:$0xff]  ;;  %v1251_v39 = vld [vmem:[%s1776_s1 + $0x30] sm:$0xff]  ;;  %v1270_v42 = vld [vmem:[%s1776_s1 + $0x28] sm:$0xff] }
   0xd   :  { %96 = vperm.xlu2 %953, %v1039_v3   ;;  %155 = vmatpush.msra.mxu0 %v1131_v21  ;;  %v1258_v40 = vld [vmem:[%s1776_s1 + $0xb0] sm:$0xff]  ;;  %v1277_v43 = vld [vmem:[%s1776_s1 + $0xa8] sm:$0xff]  ;;  %v1291_v45 = vld [vmem:[%s1776_s1 + $0x20] sm:$0xff] }
   0xe   :  { %184 = vmatpush.msra.mxu1 %v1138_v22  ;;  %213 = vmatpush.msra.mxu2 %v1143_v23  ;;  %v1263_v41 = vld [vmem:[%s1776_s1 + $0x130] sm:$0xff]  ;;  %v1282_v44 = vld [vmem:[%s1776_s1 + $0x128] sm:$0xff]  ;;  %v1296_v46 = vld [vmem:[%s1776_s1 + $0xa0] sm:$0xff] }
   0xf   :  { %326 = vmatpush.msra.mxu3 %v1131_v21  ;;  %156 = vmatpush.msra.mxu0 %v1152_v24  ;;  %v1303_v47 = vld [vmem:[%s1776_s1 + $0x120] sm:$0xff]  ;;  %v1310_v48 = vld [vmem:[%s1776_s1 + $0x18] sm:$0xff]  ;;  %v1329_v51 = vld [vmem:[%s1776_s1 + $0x10] sm:$0xff] }
  0x10   :  { %185 = vmatpush.msra.mxu1 %v1157_v25  ;;  %214 = vmatpush.msra.mxu2 %v1164_v26  ;;  %v1317_v49 = vld [vmem:[%s1776_s1 + $0x98] sm:$0xff]  ;;  %v1336_v52 = vld [vmem:[%s1776_s1 + $0x90] sm:$0xff]  ;;  %v1348_v54 = vld [vmem:[%s1776_s1 + $0x8] sm:$0xff] }
  0x11   :  { %327 = vmatpush.msra.mxu3 %v1152_v24  ;;  %157 = vmatpush.msra.mxu0 %v1171_v27  ;;  %v1322_v50 = vld [vmem:[%s1776_s1 + $0x118] sm:$0xff]  ;;  %v1341_v53 = vld [vmem:[%s1776_s1 + $0x110] sm:$0xff]  ;;  %v1355_v55 = vld [vmem:[%s1776_s1 + $0x88] sm:$0xff] }
  0x12   :  { %186 = vmatpush.msra.mxu1 %v1178_v28  ;;  %215 = vmatpush.msra.mxu2 %v1183_v29  ;;  %v1362_v56 = vld [vmem:[%s1776_s1 + $0x108] sm:$0xff]  ;;  %v1369_v57 = vld [vmem:[%s1776_s1] sm:$0xff] }
  0x13   :  { %954 = vset.pattern.permute.xlu1 %v1001_v1  ;;  %75 = vperm.xlu0 %949, %v1050_v6   ;;  %v1376_v58 = vld [vmem:[%s1776_s1 + $0x80] sm:$0xff] }
  0x14   :  { %243 = vperm.xlu1 %954, %v1039_v3   ;;  %328 = vmatpush.msra.mxu3 %v1171_v27  ;;  %v1381_v59 = vld [vmem:[%s1776_s1 + $0x100] sm:$0xff]  ;;  %s1010_s1 = smov 32  }
  0x15   :  { %955 = vset.pattern.permute.xlu2 %v1004_v5  ;;  %158 = vmatpush.msra.mxu0 %v1190_v30 }
  0x16   :  { %267 = vperm.xlu2 %955, %v1039_v3   ;;  %187 = vmatpush.msra.mxu1 %v1197_v31 }
  0x17   :  { %216 = vmatpush.msra.mxu2 %v1202_v32  ;;  %329 = vmatpush.msra.mxu3 %v1190_v30 }
  0x18   :  { %159 = vmatpush.msra.mxu0 %v1209_v33  ;;  %188 = vmatpush.msra.mxu1 %v1216_v34 }
  0x19   :  { %217 = vmatpush.msra.mxu2 %v1223_v35  ;;  %330 = vmatpush.msra.mxu3 %v1209_v33 }
  0x1a   :  { %160 = vmatpush.msra.mxu0 %v1232_v36  ;;  %189 = vmatpush.msra.mxu1 %v1239_v37 }
  0x1b   :  { %960 = vset.pattern.permute.xlu0 %v1002_v2  ;;  %218 = vmatpush.msra.mxu2 %v1244_v38 }
  0x1c   :  { %956 = vset.pattern.permute.xlu1 %v1002_v2  ;;  %102 = vperm.xlu0 %960, %v1058_v7  }
  0x1d   :  { %99 = vperm.xlu1 %956, %v1050_v6   ;;  %331 = vmatpush.msra.mxu3 %v1232_v36 }
  0x1e   :  { %957 = vset.pattern.permute.xlu2 %v1001_v1  ;;  %161 = vmatpush.msra.mxu0 %v1251_v39 }
  0x1f   :  { %246 = vperm.xlu2 %957, %v1050_v6   ;;  %190 = vmatpush.msra.mxu1 %v1258_v40 }
  0x20   :  { %219 = vmatpush.msra.mxu2 %v1263_v41  ;;  %332 = vmatpush.msra.mxu3 %v1251_v39 }
  0x21   :  { %162 = vmatpush.msra.mxu0 %v1270_v42  ;;  %191 = vmatpush.msra.mxu1 %v1277_v43 }
  0x22   :  { %220 = vmatpush.msra.mxu2 %v1282_v44  ;;  %333 = vmatpush.msra.mxu3 %v1270_v42 }
  0x23   :  { %163 = vmatpush.msra.mxu0 %v1291_v45  ;;  %192 = vmatpush.msra.mxu1 %v1296_v46 }
  0x24   :  { %965 = vset.pattern.permute.xlu0 %v1005_v8  ;;  %221 = vmatpush.msra.mxu2 %v1303_v47 }
  0x25   :  { %958 = vset.pattern.permute.xlu1 %v1004_v5  ;;  %414 = vperm.xlu0 %965, %v1039_v3  }
  0x26   :  { %270 = vperm.xlu1 %958, %v1050_v6   ;;  %334 = vmatpush.msra.mxu3 %v1291_v45 }
  0x27   :  { %959 = vset.pattern.permute.xlu2 %v1003_v4  ;;  %164 = vmatpush.msra.mxu0 %v1310_v48 }
  0x28   :  { %78 = vperm.xlu2 %959, %v1058_v7   ;;  %193 = vmatpush.msra.mxu1 %v1317_v49 }
  0x29   :  { %222 = vmatpush.msra.mxu2 %v1322_v50  ;;  %335 = vmatpush.msra.mxu3 %v1310_v48 }
  0x2a   :  { %165 = vmatpush.msra.mxu0 %v1329_v51  ;;  %194 = vmatpush.msra.mxu1 %v1336_v52 }
  0x2b   :  { %223 = vmatpush.msra.mxu2 %v1341_v53  ;;  %336 = vmatpush.msra.mxu3 %v1329_v51 }
  0x2c   :  { %166 = vmatpush.msra.mxu0 %v1348_v54  ;;  %195 = vmatpush.msra.mxu1 %v1355_v55 }
  0x2d   :  { %968 = vset.pattern.permute.xlu0 %v1006_v9  ;;  %224 = vmatpush.msra.mxu2 %v1362_v56 }
  0x2e   :  { %961 = vset.pattern.permute.xlu1 %v1001_v1  ;;  %444 = vperm.xlu0 %968, %v1058_v7   ;;  %v1428_v1 = vand.u32 127, %v64_v62 }
  0x2f   :  { %249 = vperm.xlu1 %961, %v1058_v7   ;;  %337 = vmatpush.msra.mxu3 %v1348_v54 }
  0x30   :  { %962 = vset.pattern.permute.xlu2 %v1004_v5  ;;  %167 = vmatpush.msra.mxu0 %v1369_v57  ;;  %v1446_v4 = vadd.s32 256, %v1428_v1 }
  0x31   :  { %273 = vperm.xlu2 %962, %v1058_v7   ;;  %196 = vmatpush.msra.mxu1 %v1376_v58 }
  0x32   :  { %225 = vmatpush.msra.mxu2 %v1381_v59  ;;  %338 = vmatpush.msra.mxu3 %v1369_v57 }
  0x33   :  { %352 = vmatpush.msrb.mxu0 %v1081_v12  ;;  %381 = vmatpush.msrb.mxu1 %v1086_v13 }
  0x34   :  { %494 = vmatpush.msrb.mxu2 %v1076_v11  ;;  %523 = vmatpush.msrb.mxu3 %v1081_v12 }
  0x35   :  { %353 = vmatpush.msrb.mxu0 %v1102_v16  ;;  %382 = vmatpush.msrb.mxu1 %v1107_v17 }
  0x36   :  { %971 = vset.pattern.permute.xlu0 %v1007_v10  ;;  %495 = vmatpush.msrb.mxu2 %v1097_v15 }
  0x37   :  { %963 = vset.pattern.permute.xlu1 %v1005_v8  ;;  %588 = vperm.xlu0 %971, %v1050_v6  }
  0x38   :  { %411 = vperm.xlu1 %963, %v1034_v0   ;;  %354 = vmatpush.msrb.mxu0 %v1119_v19 }
  0x39   :  { %964 = vset.pattern.permute.xlu2 %v1006_v9  ;;  %383 = vmatpush.msrb.mxu1 %v1124_v20 }
  0x3a   :  { %435 = vperm.xlu2 %964, %v1034_v0   ;;  %524 = vmatpush.msrb.mxu3 %v1102_v16 }
  0x3b   :  { %355 = vmatpush.msrb.mxu0 %v1138_v22  ;;  %496 = vmatpush.msrb.mxu2 %v1114_v18 }
  0x3c   :  { %384 = vmatpush.msrb.mxu1 %v1143_v23  ;;  %525 = vmatpush.msrb.mxu3 %v1119_v19 }
  0x3d   :  { %356 = vmatpush.msrb.mxu0 %v1157_v25  ;;  %497 = vmatpush.msrb.mxu2 %v1131_v21 }
  0x3e   :  { %385 = vmatpush.msrb.mxu1 %v1164_v26  ;;  %526 = vmatpush.msrb.mxu3 %v1138_v22 }
  0x3f   :  { %974 = vset.pattern.permute.xlu0 %v1008_v14  ;;  %357 = vmatpush.msrb.mxu0 %v1178_v28 }
  0x40   :  { %966 = vset.pattern.permute.xlu1 %v1006_v9  ;;  %498 = vmatpush.msrb.mxu2 %v1152_v24 }
  0x41   :  { %438 = vperm.xlu1 %966, %v1039_v3   ;;  %386 = vmatpush.msrb.mxu1 %v1183_v29 }
  0x42   :  { %967 = vset.pattern.permute.xlu2 %v1005_v8  ;;  %527 = vmatpush.msrb.mxu3 %v1157_v25 }
  0x43   :  { %417 = vperm.xlu2 %967, %v1050_v6   ;;  %358 = vmatpush.msrb.mxu0 %v1197_v31 }
  0x44   :  { %499 = vmatpush.msrb.mxu2 %v1171_v27  ;;  %387 = vmatpush.msrb.mxu1 %v1202_v32 }
  0x45   :  { %528 = vmatpush.msrb.mxu3 %v1178_v28  ;;  %359 = vmatpush.msrb.mxu0 %v1216_v34 }
  0x46   :  { %388 = vmatpush.msrb.mxu1 %v1223_v35  ;;  %500 = vmatpush.msrb.mxu2 %v1190_v30 }
  0x47   :  { %360 = vmatpush.msrb.mxu0 %v1239_v37  ;;  %529 = vmatpush.msrb.mxu3 %v1197_v31 }
  0x48   :  { %389 = vmatpush.msrb.mxu1 %v1244_v38  ;;  %501 = vmatpush.msrb.mxu2 %v1209_v33 }
  0x49   :  { %441 = vperm.xlu1 %966, %v1050_v6   ;;  %361 = vmatpush.msrb.mxu0 %v1258_v40 }
  0x4a   :  { %530 = vmatpush.msrb.mxu3 %v1216_v34  ;;  %390 = vmatpush.msrb.mxu1 %v1263_v41 }
  0x4b   :  { %420 = vperm.xlu2 %967, %v1058_v7   ;;  %502 = vmatpush.msrb.mxu2 %v1232_v36 }
  0x4c   :  { %362 = vmatpush.msrb.mxu0 %v1277_v43  ;;  %531 = vmatpush.msrb.mxu3 %v1239_v37 }
  0x4d   :  { %391 = vmatpush.msrb.mxu1 %v1282_v44  ;;  %503 = vmatpush.msrb.mxu2 %v1251_v39 }
  0x4e   :  { %363 = vmatpush.msrb.mxu0 %v1296_v46  ;;  %532 = vmatpush.msrb.mxu3 %v1258_v40 }
  0x4f   :  { %392 = vmatpush.msrb.mxu1 %v1303_v47  ;;  %504 = vmatpush.msrb.mxu2 %v1270_v42 }
  0x50   :  { %364 = vmatpush.msrb.mxu0 %v1317_v49  ;;  %533 = vmatpush.msrb.mxu3 %v1277_v43 }
  0x51   :  { %969 = vset.pattern.permute.xlu1 %v1007_v10  ;;  %393 = vmatpush.msrb.mxu1 %v1322_v50 }
  0x52   :  { %582 = vperm.xlu1 %969, %v1034_v0   ;;  %365 = vmatpush.msrb.mxu0 %v1336_v52 }
  0x53   :  { %970 = vset.pattern.permute.xlu2 %v1008_v14  ;;  %394 = vmatpush.msrb.mxu1 %v1341_v53 }
  0x54   :  { %606 = vperm.xlu2 %970, %v1034_v0   ;;  %366 = vmatpush.msrb.mxu0 %v1355_v55 }
  0x55   :  { %395 = vmatpush.msrb.mxu1 %v1362_v56  ;;  %505 = vmatpush.msrb.mxu2 %v1291_v45 }
  0x56   :  { %367 = vmatpush.msrb.mxu0 %v1376_v58  ;;  %534 = vmatpush.msrb.mxu3 %v1296_v46 }
  0x57   :  { %396 = vmatpush.msrb.mxu1 %v1381_v59  ;;  %506 = vmatpush.msrb.mxu2 %v1310_v48 }
  0x58   :  { %535 = vmatpush.msrb.mxu3 %v1317_v49 }
  0x59   :  { %507 = vmatpush.msrb.mxu2 %v1329_v51 }
  0x5a   :  { %585 = vperm.xlu1 %969, %v1039_v3   ;;  %536 = vmatpush.msrb.mxu3 %v1336_v52 }
  0x5b   :  { %508 = vmatpush.msrb.mxu2 %v1348_v54 }
  0x5c   :  { %609 = vperm.xlu2 %970, %v1039_v3   ;;  %v1441_v3 = vadd.s32 128, %v1428_v1  ;;  %537 = vmatpush.msrb.mxu3 %v1355_v55 }
  0x5d   :  { %509 = vmatpush.msrb.mxu2 %v1369_v57 }
  0x5e   :  { %v1393_v60 = vpop.permute.xlu2 %72  ;;  %538 = vmatpush.msrb.mxu3 %v1376_v58 }
  0x5f   :  { %vm83_vm12 = vcmp.eq.s32.totalorder %v1428_v1, %v1393_v60  ;;  %vm84_vm14 = vcmp.eq.s32.totalorder %v1441_v3, %v1393_v60 }
  0x62   :  { %972 = vset.pattern.permute.xlu1 %v1008_v14 }
  0x63   :  { %612 = vperm.xlu1 %972, %v1050_v6  }
  0x64   :  { %973 = vset.pattern.permute.xlu2 %v1007_v10 }
  0x65   :  { %591 = vperm.xlu2 %973, %v1058_v7  }
  0x67   :  { %v1415_v61 = vpop.permute.xlu2 %96 }
  0x68   :  { %vm107_vm13 = vcmp.eq.s32.totalorder %v1428_v1, %v1415_v61  ;;  %vm108_vm15 = vcmp.eq.s32.totalorder %v1441_v3, %v1415_v61 }
  0x6b   :  { %615 = vperm.xlu1 %972, %v1058_v7   ;;  %v1009_v7 = vmov 1.0  }
  0x70   :  { %v1436_v2 = vpop.permute.xlu2 %267 }
  0x74   :  { %v1421_v63 = vpop.permute.xlu1 %240  ;;  %v94_v0 = vpop.permute.xlu0 %93 }
  0x75   :  { %vm104_vm0 = vcmp.eq.s32.totalorder %v1428_v1, %v94_v0  ;;  %vm105_vm1 = vcmp.eq.s32.totalorder %v1441_v3, %v94_v0  ;;  %vm106_vm4 = vcmp.eq.s32.totalorder %v1446_v4, %v94_v0  ;;  %vm251_vm10 = vcmp.eq.s32.totalorder %v1428_v1, %v1421_v63 }
  0x79   :  { %v1483_v8 = vpop.permute.xlu2 %246 }
  0x7d   :  { %v1451_v5 = vpop.permute.xlu1 %264  ;;  %v70_v6 = vpop.permute.xlu0 %69 }
  0x7e   :  { %vm80_vm2 = vcmp.eq.s32.totalorder %v1428_v1, %v70_v6  ;;  %vm81_vm3 = vcmp.eq.s32.totalorder %v1441_v3, %v70_v6  ;;  %vm82_vm6 = vcmp.eq.s32.totalorder %v1446_v4, %v70_v6  ;;  %vm275_vm7 = vcmp.eq.s32.totalorder %v1428_v1, %v1451_v5 }
  0x7f   :  { %vm116_vm5 = vmor %vm80_vm2, %vm104_vm0  ;;  %vm278_vm0 = vcmp.eq.s32.totalorder %v1428_v1, %v1436_v2  ;;  %vm85_vm2 = vcmp.eq.s32.totalorder %v1446_v4, %v1393_v60 }
  0x80   :  { %849 = vmatmul.msk.f32.vlgmr.msra.gmra.mxu0 %vm116_vm5, %v1009_v7  ;;  %vm117_vm8 = vmor %vm81_vm3, %vm105_vm1  ;;  %vm109_vm3 = vcmp.eq.s32.totalorder %v1446_v4, %v1415_v61 }
  0x81   :  { %853 = vmatmul.msk.f32.vlgmr.msra.gmra.mxu1 %vm117_vm8, %v1009_v7  ;;  %vm118_vm9 = vmor %vm82_vm6, %vm106_vm4  ;;  %552 = vmatpush.msra.mxu0 %v1086_v13 }
  0x82   :  { %857 = vmatmul.msk.f32.vlgmr.msra.gmra.mxu2 %vm118_vm9, %v1009_v7  ;;  %vm287_vm11 = vmor %vm251_vm10, %vm275_vm7  ;;  %665 = vmatpush.msra.mxu1 %v1076_v11  ;;  %v79_v11 = vpop.permute.xlu2 %78 }
  0x83   :  { %873 = vmatmul.msk.f32.vlgmr.msra.gmra.mxu3 %vm287_vm11, %v1009_v7  ;;  %vm119_vm1 = vmor %vm83_vm12, %vm107_vm13  ;;  %553 = vmatpush.msra.mxu0 %v1107_v17 }
  0x84   :  { %vm120_vm4 = vmor %vm84_vm14, %vm108_vm15  ;;  %666 = vmatpush.msra.mxu1 %v1097_v15  ;;  %694 = vmatpush.msra.mxu2 %v1081_v12 }
  0x85   :  { %vm121_vm7 = vmor %vm85_vm2, %vm109_vm3  ;;  %v76_v10 = vpop.permute.xlu0 %75  ;;  %554 = vmatpush.msra.mxu0 %v1124_v20  ;;  %723 = vmatpush.msra.mxu3 %v1086_v13  ;;  %vm90_vm3 = vcmp.eq.s32.totalorder %v1441_v3, %v79_v11 }
  0x86   :  { %v1491_v9 = vpop.permute.xlu1 %243  ;;  %vm86_vm8 = vcmp.eq.s32.totalorder %v1428_v1, %v76_v10  ;;  %667 = vmatpush.msra.mxu1 %v1114_v18  ;;  %vm87_vm13 = vcmp.eq.s32.totalorder %v1441_v3, %v76_v10  ;;  %vm88_vm15 = vcmp.eq.s32.totalorder %v1446_v4, %v76_v10  ;;  %695 = vmatpush.msra.mxu2 %v1102_v16 }
  0x87   :  { %vm254_vm5 = vcmp.eq.s32.totalorder %v1428_v1, %v1491_v9  ;;  %555 = vmatpush.msra.mxu0 %v1143_v23  ;;  %724 = vmatpush.msra.mxu3 %v1107_v17 }
  0x88   :  { %850 = vmatmul.msk.f32.gmra.mxu0 %vm119_vm1, %v1009_v7  ;;  %vm290_vm6 = vmor %vm254_vm5, %vm278_vm0  ;;  %668 = vmatpush.msra.mxu1 %v1131_v21  ;;  %vm89_vm1 = vcmp.eq.s32.totalorder %v1428_v1, %v79_v11  ;;  %vm91_vm5 = vcmp.eq.s32.totalorder %v1446_v4, %v79_v11 }
  0x89   :  { %854 = vmatmul.msk.f32.gmra.mxu1 %vm120_vm4, %v1009_v7  ;;  %556 = vmatpush.msra.mxu0 %v1164_v26 }
  0x8a   :  { %858 = vmatmul.msk.f32.gmra.mxu2 %vm121_vm7, %v1009_v7  ;;  %669 = vmatpush.msra.mxu1 %v1152_v24 }
  0x8b   :  { %874 = vmatmul.msk.f32.gmra.mxu3 %vm290_vm6, %v1009_v7  ;;  %557 = vmatpush.msra.mxu0 %v1183_v29  ;;  %v1543_v12 = vpop.permute.xlu2 %273 }
  0x8c   :  { %670 = vmatpush.msra.mxu1 %v1171_v27  ;;  %696 = vmatpush.msra.mxu2 %v1119_v19 }
  0x8d   :  { %558 = vmatpush.msra.mxu0 %v1202_v32  ;;  %725 = vmatpush.msra.mxu3 %v1124_v20 }
  0x8e   :  { %v103_v15 = vpop.permute.xlu0 %102  ;;  %671 = vmatpush.msra.mxu1 %v1190_v30  ;;  %697 = vmatpush.msra.mxu2 %v1138_v22 }
  0x8f   :  { %v100_v14 = vpop.permute.xlu1 %99  ;;  %vm113_vm2 = vcmp.eq.s32.totalorder %v1428_v1, %v103_v15  ;;  %vm114_vm4 = vcmp.eq.s32.totalorder %v1441_v3, %v103_v15  ;;  %vm115_vm6 = vcmp.eq.s32.totalorder %v1446_v4, %v103_v15  ;;  %559 = vmatpush.msra.mxu0 %v1223_v35  ;;  %726 = vmatpush.msra.mxu3 %v1143_v23 }
  0x90   :  { %vm110_vm9 = vcmp.eq.s32.totalorder %v1428_v1, %v100_v14  ;;  %vm111_vm10 = vcmp.eq.s32.totalorder %v1441_v3, %v100_v14  ;;  %vm112_vm11 = vcmp.eq.s32.totalorder %v1446_v4, %v100_v14  ;;  %vm125_vm7 = vmor %vm89_vm1, %vm113_vm2  ;;  %672 = vmatpush.msra.mxu1 %v1209_v33  ;;  %698 = vmatpush.msra.mxu2 %v1157_v25 }
  0x91   :  { %vm122_vm12 = vmor %vm86_vm8, %vm110_vm9  ;;  %560 = vmatpush.msra.mxu0 %v1244_v38  ;;  %727 = vmatpush.msra.mxu3 %v1164_v26  ;;  %vm253_vm1 = vcmp.eq.s32.totalorder %v1446_v4, %v1421_v63 }
  0x92   :  { %851 = vmatmul.msk.f32.gmra.mxu0 %vm122_vm12, %v1009_v7  ;;  %vm123_vm14 = vmor %vm87_vm13, %vm111_vm10  ;;  %vm257_vm10 = vcmp.eq.s32.totalorder %v1428_v1, %v1483_v8  ;;  %vm276_vm13 = vcmp.eq.s32.totalorder %v1441_v3, %v1451_v5  ;;  %673 = vmatpush.msra.mxu1 %v1232_v36 }
  0x93   :  { %855 = vmatmul.msk.f32.gmra.mxu1 %vm123_vm14, %v1009_v7  ;;  %vm124_vm0 = vmor %vm88_vm15, %vm112_vm11  ;;  %561 = vmatpush.msra.mxu0 %v1263_v41  ;;  %vm277_vm14 = vcmp.eq.s32.totalorder %v1446_v4, %v1451_v5  ;;  %vm252_vm15 = vcmp.eq.s32.totalorder %v1441_v3, %v1421_v63 }
  0x94   :  { %859 = vmatmul.msk.f32.gmra.mxu2 %vm124_vm0, %v1009_v7  ;;  %vm126_vm8 = vmor %vm90_vm3, %vm114_vm4  ;;  %vm284_vm0 = vcmp.eq.s32.totalorder %v1428_v1, %v1543_v12  ;;  %v1579_v16 = vpop.permute.xlu2 %435  ;;  %728 = vmatpush.msra.mxu3 %v1183_v29 }
  0x95   :  { %vm127_vm9 = vmor %vm91_vm5, %vm115_vm6  ;;  %562 = vmatpush.msra.mxu0 %v1282_v44  ;;  %699 = vmatpush.msra.mxu2 %v1178_v28  ;;  %vm255_vm6 = vcmp.eq.s32.totalorder %v1441_v3, %v1491_v9 }
  0x96   :  { %vm288_vm2 = vmor %vm252_vm15, %vm276_vm13  ;;  %674 = vmatpush.msra.mxu1 %v1251_v39  ;;  %729 = vmatpush.msra.mxu3 %v1202_v32  ;;  %vm447_vm13 = vcmp.eq.s32.totalorder %v1441_v3, %v1579_v16 }
  0x97   :  { %563 = vmatpush.msra.mxu0 %v1303_v47  ;;  %700 = vmatpush.msra.mxu2 %v1197_v31  ;;  %vm289_vm3 = vmor %vm253_vm1, %vm277_vm14  ;;  %v1641_v20 = vpop.permute.xlu0 %414 }
  0x98   :  { %v1549_v13 = vpop.permute.xlu1 %270  ;;  %675 = vmatpush.msra.mxu1 %v1270_v42  ;;  %730 = vmatpush.msra.mxu3 %v1223_v35 }
  0x99   :  { %vm281_vm11 = vcmp.eq.s32.totalorder %v1428_v1, %v1549_v13  ;;  %564 = vmatpush.msra.mxu0 %v1322_v50  ;;  %701 = vmatpush.msra.mxu2 %v1216_v34 }
  0x9a   :  { %852 = vmatmul.msk.f32.gmra.mxu0 %vm125_vm7, %v1009_v7  ;;  %vm293_vm12 = vmor %vm257_vm10, %vm281_vm11  ;;  %vm279_vm7 = vcmp.eq.s32.totalorder %v1441_v3, %v1436_v2  ;;  %676 = vmatpush.msra.mxu1 %v1291_v45  ;;  %vm446_vm11 = vcmp.eq.s32.totalorder %v1428_v1, %v1579_v16 }
  0x9b   :  { %856 = vmatmul.msk.f32.gmra.mxu1 %vm126_vm8, %v1009_v7  ;;  %875 = vmatmul.msk.f32.gmra.mxu3 %vm293_vm12, %v1009_v7  ;;  %vm256_vm8 = vcmp.eq.s32.totalorder %v1446_v4, %v1491_v9  ;;  %vm291_vm10 = vmor %vm255_vm6, %vm279_vm7  ;;  %vm259_vm6 = vcmp.eq.s32.totalorder %v1446_v4, %v1483_v8 }
  0x9c   :  { %860 = vmatmul.msk.f32.gmra.mxu2 %vm127_vm9, %v1009_v7  ;;  %565 = vmatpush.msra.mxu0 %v1341_v53  ;;  %vm280_vm9 = vcmp.eq.s32.totalorder %v1446_v4, %v1436_v2 }
  0x9d   :  { %702 = vmatpush.msra.mxu2 %v1239_v37  ;;  %731 = vmatpush.msra.mxu3 %v1244_v38  ;;  %vm292_vm12 = vmor %vm256_vm8, %vm280_vm9  ;;  %v1620_v19 = vpop.permute.xlu2 %417  ;;  %vm425_vm8 = vcmp.eq.s32.totalorder %v1428_v1, %v1641_v20  ;;  %vm426_vm9 = vcmp.eq.s32.totalorder %v1441_v3, %v1641_v20 }
  0x9e   :  { %566 = vmatpush.msra.mxu0 %v1362_v56  ;;  %677 = vmatpush.msra.mxu1 %v1310_v48 }
  0x9f   :  { %703 = vmatpush.msra.mxu2 %v1258_v40  ;;  %732 = vmatpush.msra.mxu3 %v1263_v41 }
  0xa0   :  { %567 = vmatpush.msra.mxu0 %v1381_v59  ;;  %678 = vmatpush.msra.mxu1 %v1329_v51  ;;  %v445_v24 = vpop.permute.xlu0 %444 }
  0xa1   :  { %v1585_v17 = vpop.permute.xlu1 %249  ;;  %704 = vmatpush.msra.mxu2 %v1277_v43  ;;  %733 = vmatpush.msra.mxu3 %v1282_v44 }
  0xa2   :  { %877 = vmatmul.msk.f32.vlgmr.msrb.gmra.mxu0 %vm288_vm2, %v1009_v7  ;;  %vm260_vm4 = vcmp.eq.s32.totalorder %v1428_v1, %v1585_v17  ;;  %vm282_vm2 = vcmp.eq.s32.totalorder %v1441_v3, %v1549_v13  ;;  %679 = vmatpush.msra.mxu1 %v1348_v54 }
  0xa3   :  { %881 = vmatmul.msk.f32.vlgmr.msrb.gmra.mxu1 %vm289_vm3, %v1009_v7  ;;  %vm296_vm5 = vmor %vm260_vm4, %vm284_vm0  ;;  %705 = vmatpush.msra.mxu2 %v1296_v46  ;;  %vm283_vm3 = vcmp.eq.s32.totalorder %v1446_v4, %v1549_v13  ;;  %vm258_vm4 = vcmp.eq.s32.totalorder %v1441_v3, %v1483_v8 }
  0xa4   :  { %876 = vmatmul.msk.f32.gmra.mxu3 %vm296_vm5, %v1009_v7  ;;  %680 = vmatpush.msra.mxu1 %v1369_v57  ;;  %vm294_vm5 = vmor %vm258_vm4, %vm282_vm2  ;;  %vm428_vm4 = vcmp.eq.s32.totalorder %v1428_v1, %v1620_v19 }
  0xa5   :  { %706 = vmatpush.msra.mxu2 %v1317_v49  ;;  %734 = vmatpush.msra.mxu3 %v1303_v47  ;;  %vm295_vm7 = vmor %vm259_vm6, %vm283_vm3  ;;  %v1661_v22 = vpop.permute.xlu2 %420 }
  0xa7   :  { %707 = vmatpush.msra.mxu2 %v1336_v52  ;;  %735 = vmatpush.msra.mxu3 %v1322_v50 }
  0xa9   :  { %708 = vmatpush.msra.mxu2 %v1355_v55  ;;  %736 = vmatpush.msra.mxu3 %v1341_v53  ;;  %v589_v29 = vpop.permute.xlu0 %588 }
  0xaa   :  { %v1617_v18 = vpop.permute.xlu1 %411  ;;  %878 = vmatmul.msk.f32.gmra.mxu0 %vm291_vm10, %v1009_v7 }
  0xab   :  { %vm422_vm14 = vcmp.eq.s32.totalorder %v1428_v1, %v1617_v18  ;;  %vm423_vm15 = vcmp.eq.s32.totalorder %v1441_v3, %v1617_v18  ;;  %882 = vmatmul.msk.f32.gmra.mxu1 %vm292_vm12, %v1009_v7  ;;  %709 = vmatpush.msra.mxu2 %v1376_v58 }
  0xac   :  { %vm458_vm0 = vmor %vm422_vm14, %vm446_vm11  ;;  %vm261_vm14 = vcmp.eq.s32.totalorder %v1441_v3, %v1585_v17  ;;  %737 = vmatpush.msra.mxu3 %v1362_v56 }
  0xad   :  { %897 = vmatmul.msk.f32.vlgmr.msrb.gmra.mxu2 %vm458_vm0, %v1009_v7  ;;  %vm459_vm1 = vmor %vm423_vm15, %vm447_vm13  ;;  %vm285_vm15 = vcmp.eq.s32.totalorder %v1441_v3, %v1543_v12  ;;  %vm262_vm0 = vcmp.eq.s32.totalorder %v1446_v4, %v1585_v17 }
  0xae   :  { %901 = vmatmul.msk.f32.vlgmr.msrb.gmra.mxu3 %vm459_vm1, %v1009_v7  ;;  %vm286_vm1 = vcmp.eq.s32.totalorder %v1446_v4, %v1543_v12  ;;  %vm297_vm2 = vmor %vm261_vm14, %vm285_vm15  ;;  %v607_v25 = vpop.permute.xlu2 %606  ;;  %vm455_vm14 = vcmp.eq.s32.totalorder %v1428_v1, %v445_v24  ;;  %vm432_vm15 = vcmp.eq.s32.totalorder %v1441_v3, %v1661_v22 }
  0xaf   :  { %738 = vmatpush.msra.mxu3 %v1381_v59  ;;  %vm298_vm3 = vmor %vm262_vm0, %vm286_vm1  ;;  %vm456_vm0 = vcmp.eq.s32.totalorder %v1441_v3, %v445_v24  ;;  %vm617_vm1 = vcmp.eq.s32.totalorder %v1428_v1, %v607_v25 }
  0xb2   :  { %879 = vmatmul.msk.f32.gmra.mxu0 %vm294_vm5, %v1009_v7  ;;  %vm429_vm5 = vcmp.eq.s32.totalorder %v1441_v3, %v1620_v19 }
  0xb3   :  { %883 = vmatmul.msk.f32.gmra.mxu1 %vm295_vm7, %v1009_v7  ;;  %v439_v21 = vpop.permute.xlu1 %438 }
  0xb4   :  { %vm449_vm10 = vcmp.eq.s32.totalorder %v1428_v1, %v439_v21  ;;  %vm450_vm11 = vcmp.eq.s32.totalorder %v1441_v3, %v439_v21 }
  0xb5   :  { %vm461_vm12 = vmor %vm425_vm8, %vm449_vm10  ;;  %vm424_vm10 = vcmp.eq.s32.totalorder %v1446_v4, %v1617_v18 }
  0xb6   :  { %898 = vmatmul.msk.f32.gmra.mxu2 %vm461_vm12, %v1009_v7  ;;  %vm462_vm13 = vmor %vm426_vm9, %vm450_vm11  ;;  %vm448_vm9 = vcmp.eq.s32.totalorder %v1446_v4, %v1579_v16  ;;  %v610_v27 = vpop.permute.xlu2 %609 }
  0xb7   :  { %902 = vmatmul.msk.f32.gmra.mxu3 %vm462_vm13, %v1009_v7  ;;  %vm460_vm12 = vmor %vm424_vm10, %vm448_vm9  ;;  %vm431_vm13 = vcmp.eq.s32.totalorder %v1428_v1, %v1661_v22  ;;  %vm619_vm10 = vcmp.eq.s32.totalorder %v1446_v4, %v607_v25 }
  0xba   :  { %880 = vmatmul.msk.f32.gmra.mxu0 %vm297_vm2, %v1009_v7  ;;  %vm467_vm2 = vmor %vm431_vm13, %vm455_vm14  ;;  %vm620_vm14 = vcmp.eq.s32.totalorder %v1428_v1, %v610_v27 }
  0xbb   :  { %884 = vmatmul.msk.f32.gmra.mxu1 %vm298_vm3, %v1009_v7  ;;  %v442_v23 = vpop.permute.xlu1 %441 }
  0xbc   :  { %vm452_vm6 = vcmp.eq.s32.totalorder %v1428_v1, %v442_v23  ;;  %vm453_vm7 = vcmp.eq.s32.totalorder %v1441_v3, %v442_v23 }
  0xbd   :  { %vm464_vm8 = vmor %vm428_vm4, %vm452_vm6  ;;  %vm427_vm6 = vcmp.eq.s32.totalorder %v1446_v4, %v1641_v20 }
  0xbe   :  { %899 = vmatmul.msk.f32.gmra.mxu2 %vm464_vm8, %v1009_v7  ;;  %vm465_vm11 = vmor %vm429_vm5, %vm453_vm7  ;;  %vm451_vm7 = vcmp.eq.s32.totalorder %v1446_v4, %v439_v21  ;;  %vm618_vm8 = vcmp.eq.s32.totalorder %v1441_v3, %v607_v25 }
  0xbf   :  { %903 = vmatmul.msk.f32.gmra.mxu3 %vm465_vm11, %v1009_v7  ;;  %vm468_vm4 = vmor %vm432_vm15, %vm456_vm0  ;;  %v592_v31 = vpop.permute.xlu2 %591 }
  0xc2   :  { %905 = vmatmul.msk.f32.vlgmr.msra.gmra.mxu0 %vm460_vm12, %v1009_v7  ;;  %vm463_vm12 = vmor %vm427_vm6, %vm451_vm7  ;;  %vm621_vm6 = vcmp.eq.s32.totalorder %v1441_v3, %v610_v27 }
  0xc4   :  { %v583_v26 = vpop.permute.xlu1 %582 }
  0xc5   :  { %vm593_vm3 = vcmp.eq.s32.totalorder %v1428_v1, %v583_v26  ;;  %vm594_vm9 = vcmp.eq.s32.totalorder %v1441_v3, %v583_v26  ;;  %vm595_vm11 = vcmp.eq.s32.totalorder %v1446_v4, %v583_v26 }
  0xc6   :  { %vm629_vm5 = vmor %vm593_vm3, %vm617_vm1  ;;  %900 = vmatmul.msk.f32.gmra.mxu2 %vm467_vm2, %v1009_v7  ;;  %vm430_vm2 = vcmp.eq.s32.totalorder %v1446_v4, %v1620_v19  ;;  %vm454_vm3 = vcmp.eq.s32.totalorder %v1446_v4, %v442_v23 }
  0xc7   :  { %904 = vmatmul.msk.f32.gmra.mxu3 %vm468_vm4, %v1009_v7  ;;  %921 = vmatmul.msk.f32.vlgmr.msra.gmra.mxu1 %vm629_vm5, %v1009_v7  ;;  %vm630_vm13 = vmor %vm594_vm9, %vm618_vm8  ;;  %vm622_vm8 = vcmp.eq.s32.totalorder %v1446_v4, %v610_v27  ;;  %vm599_vm9 = vcmp.eq.s32.totalorder %v1428_v1, %v589_v29 }
  0xc8   :  { %vm631_vm15 = vmor %vm595_vm11, %vm619_vm10 }
  0xc9   :  { %vm466_vm4 = vmor %vm430_vm2, %vm454_vm3  ;;  %vm601_vm3 = vcmp.eq.s32.totalorder %v1446_v4, %v589_v29 }
  0xca   :  { %906 = vmatmul.msk.f32.gmra.mxu0 %vm463_vm12, %v1009_v7 }
  0xcc   :  { %v586_v28 = vpop.permute.xlu1 %585 }
  0xcd   :  { %vm596_vm0 = vcmp.eq.s32.totalorder %v1428_v1, %v586_v28  ;;  %vm597_vm5 = vcmp.eq.s32.totalorder %v1441_v3, %v586_v28  ;;  %vm598_vm7 = vcmp.eq.s32.totalorder %v1446_v4, %v586_v28 }
  0xce   :  { %925 = vmatmul.msk.f32.vlgmr.msra.gmra.mxu2 %vm630_vm13, %v1009_v7  ;;  %vm632_vm1 = vmor %vm596_vm0, %vm620_vm14  ;;  %vm433_vm13 = vcmp.eq.s32.totalorder %v1446_v4, %v1661_v22  ;;  %vm457_vm14 = vcmp.eq.s32.totalorder %v1446_v4, %v445_v24  ;;  %vm600_vm0 = vcmp.eq.s32.totalorder %v1441_v3, %v589_v29 }
  0xcf   :  { %929 = vmatmul.msk.f32.vlgmr.msra.gmra.mxu3 %vm631_vm15, %v1009_v7  ;;  %922 = vmatmul.msk.f32.gmra.mxu1 %vm632_vm1, %v1009_v7  ;;  %vm633_vm10 = vmor %vm597_vm5, %vm621_vm6 }
  0xd0   :  { %vm634_vm11 = vmor %vm598_vm7, %vm622_vm8  ;;  %vm602_vm7 = vcmp.eq.s32.totalorder %v1428_v1, %v592_v31 }
  0xd1   :  { %vm469_vm2 = vmor %vm433_vm13, %vm457_vm14 }
  0xd2   :  { %907 = vmatmul.msk.f32.gmra.mxu0 %vm466_vm4, %v1009_v7 }
  0xd5   :  { %v613_v30 = vpop.permute.xlu1 %612 }
  0xd6   :  { %926 = vmatmul.msk.f32.gmra.mxu2 %vm633_vm10, %v1009_v7  ;;  %vm623_vm12 = vcmp.eq.s32.totalorder %v1428_v1, %v613_v30  ;;  %vm624_vm1 = vcmp.eq.s32.totalorder %v1441_v3, %v613_v30  ;;  %vm625_vm4 = vcmp.eq.s32.totalorder %v1446_v4, %v613_v30  ;;  %vm603_vm10 = vcmp.eq.s32.totalorder %v1441_v3, %v592_v31 }
  0xd7   :  { %930 = vmatmul.msk.f32.gmra.mxu3 %vm634_vm11, %v1009_v7  ;;  %vm635_vm15 = vmor %vm599_vm9, %vm623_vm12  ;;  %vm604_vm12 = vcmp.eq.s32.totalorder %v1446_v4, %v592_v31 }
  0xd8   :  { %923 = vmatmul.msk.f32.gmra.mxu1 %vm635_vm15, %v1009_v7  ;;  %vm636_vm5 = vmor %vm600_vm0, %vm624_vm1  ;;  %vm800_vm0 = vcmask 261120   ;;  %vm810_vm1 = vcmask 785408  }
  0xd9   :  { %vm637_vm6 = vmor %vm601_vm3, %vm625_vm4 }
  0xda   :  { %908 = vmatmul.msk.f32.gmra.mxu0 %vm469_vm2, %v1009_v7  ;;  %vm805_vm2 = vcmask 523264  }
  0xdd   :  { %v616_v32 = vpop.permute.xlu1 %615 }
  0xde   :  { %927 = vmatmul.msk.f32.gmra.mxu2 %vm636_vm5, %v1009_v7  ;;  %vm626_vm8 = vcmp.eq.s32.totalorder %v1428_v1, %v616_v32  ;;  %vm627_vm11 = vcmp.eq.s32.totalorder %v1441_v3, %v616_v32  ;;  %vm628_vm13 = vcmp.eq.s32.totalorder %v1446_v4, %v616_v32 }
  0xdf   :  { %931 = vmatmul.msk.f32.gmra.mxu3 %vm637_vm6, %v1009_v7  ;;  %vm638_vm9 = vmor %vm602_vm7, %vm626_vm8 }
  0xe0   :  { %924 = vmatmul.msk.f32.gmra.mxu1 %vm638_vm9, %v1009_v7  ;;  %vm639_vm14 = vmor %vm603_vm10, %vm627_vm11 }
  0xe1   :  { %vm640_vm15 = vmor %vm604_vm12, %vm628_vm13 }
  0xe6   :  { %928 = vmatmul.msk.f32.gmra.mxu2 %vm639_vm14, %v1009_v7 }
  0xe7   :  { %932 = vmatmul.msk.f32.gmra.mxu3 %vm640_vm15, %v1009_v7 }
  0xfd   :  { %v169_v33 = vpop.f32.mrf.mxu0 }
  0xfe   :  { %v198_v34 = vpop.f32.mrf.mxu1 }
  0xff   :  { %v199_v35 = vadd.f32 %v198_v34, %v169_v33 }
 0x105   :  { %v227_v36 = vpop.f32.mrf.mxu2  ;;  %v172_v37 = vpop.f32.mrf.mxu0 }
 0x106   :  { %v1748_v38 = vadd.f32 %v227_v36, %v199_v35  ;;  %v201_v39 = vpop.f32.mrf.mxu1  ;;  %v340_v41 = vpop.f32.mrf.mxu3 }
 0x107   :  { %v202_v40 = vadd.f32 %v201_v39, %v172_v37 }
 0x10d   :  { %v230_v42 = vpop.f32.mrf.mxu2 }
 0x10e   :  { %v1750_v43 = vadd.f32 %v230_v42, %v202_v40  ;;  %v343_v47 = vpop.f32.mrf.mxu3 }
 0x10f   :  { %v175_v44 = vpop.f32.mrf.mxu0 }
 0x110   :  { %v204_v45 = vpop.f32.mrf.mxu1 }
 0x111   :  { %v205_v46 = vadd.f32 %v204_v45, %v175_v44 }
 0x117   :  { %v233_v48 = vpop.f32.mrf.mxu2  ;;  %v178_v49 = vpop.f32.mrf.mxu0 }
 0x118   :  { %v1752_v50 = vadd.f32 %v233_v48, %v205_v46  ;;  %v207_v51 = vpop.f32.mrf.mxu1 }
 0x119   :  { %v208_v52 = vadd.f32 %v207_v51, %v178_v49 }
 0x11e   :  { %v346_v53 = vpop.f32.mrf.mxu3 }
 0x11f   :  { %v236_v54 = vpop.f32.mrf.mxu2  ;;  %v369_v55 = vpop.f32.mrf.mxu0 }
 0x120   :  { %v1754_v56 = vadd.f32 %v236_v54, %v208_v52  ;;  %v370_v57 = vadd.f32 %v369_v55, %v340_v41  ;;  %v398_v58 = vpop.f32.mrf.mxu1 }
 0x122   :  { %v399_v59 = vadd.f32 %v398_v58, %v370_v57 }
 0x124   :  { %756 = vrot.lane.b32.xlu2 %v399_v59, %s1010_s1 }
 0x127   :  { %v372_v60 = vpop.f32.mrf.mxu0  ;;  %v349_v61 = vpop.f32.mrf.mxu3 }
 0x128   :  { %v373_v62 = vadd.f32 %v372_v60, %v343_v47  ;;  %v401_v63 = vpop.f32.mrf.mxu1 }
 0x12a   :  { %v402_v0 = vadd.f32 %v401_v63, %v373_v62 }
 0x12c   :  { %758 = vrot.lane.b32.xlu0 %v402_v0, %s1010_s1 }
 0x12f   :  { %v375_v1 = vpop.f32.mrf.mxu0 }
 0x130   :  { %v376_v2 = vadd.f32 %v375_v1, %v346_v53  ;;  %v404_v3 = vpop.f32.mrf.mxu1  ;;  %v511_v4 = vpop.f32.mrf.mxu2 }
 0x131   :  { %v540_v6 = vpop.f32.mrf.mxu3 }
 0x132   :  { %v405_v5 = vadd.f32 %v404_v3, %v376_v2  ;;  %v541_v15 = vadd.f32 %v540_v6, %v511_v4 }
 0x134   :  { %760 = vrot.lane.b32.xlu1 %v405_v5, %s1010_s1 }
 0x137   :  { %v378_v7 = vpop.f32.mrf.mxu0 }
 0x138   :  { %v379_v8 = vadd.f32 %v378_v7, %v349_v61  ;;  %v407_v9 = vpop.f32.mrf.mxu1 }
 0x139   :  { %v514_v10 = vpop.f32.mrf.mxu2 }
 0x13a   :  { %v408_v11 = vadd.f32 %v407_v9, %v379_v8  ;;  %v543_v14 = vpop.f32.mrf.mxu3 }
 0x13b   :  { %v544_v18 = vadd.f32 %v543_v14, %v514_v10 }
 0x13c   :  { %762 = vrot.lane.b32.xlu2 %v408_v11, %s1010_s1 }
 0x13f   :  { %v569_v12 = vpop.f32.mrf.mxu0 }
 0x140   :  { %v570_v13 = vadd.f32 %v569_v12, %v541_v15 }
 0x141   :  { %v517_v16 = vpop.f32.mrf.mxu2 }
 0x142   :  { %v546_v17 = vpop.f32.mrf.mxu3  ;;  %772 = vrot.lane.b32.xlu0 %v570_v13, %s1011_s25 }
 0x143   :  { %v547_v24 = vadd.f32 %v546_v17, %v517_v16 }
 0x144   :  { %v682_v23 = vpop.f32.mrf.mxu1 }
 0x147   :  { %v572_v19 = vpop.f32.mrf.mxu0 }
 0x148   :  { %v573_v20 = vadd.f32 %v572_v19, %v544_v18 }
 0x149   :  { %v520_v21 = vpop.f32.mrf.mxu2 }
 0x14a   :  { %v549_v22 = vpop.f32.mrf.mxu3  ;;  %774 = vrot.lane.b32.xlu1 %v573_v20, %s1011_s25 }
 0x14b   :  { %v550_v32 = vadd.f32 %v549_v22, %v520_v21 }
 0x14c   :  { %v685_v31 = vpop.f32.mrf.mxu1 }
 0x14f   :  { %v575_v25 = vpop.f32.mrf.mxu0 }
 0x150   :  { %v576_v26 = vadd.f32 %v575_v25, %v547_v24 }
 0x151   :  { %v711_v27 = vpop.f32.mrf.mxu2 }
 0x152   :  { %v712_v28 = vadd.f32 %v711_v27, %v682_v23  ;;  %v740_v29 = vpop.f32.mrf.mxu3  ;;  %776 = vrot.lane.b32.xlu2 %v576_v26, %s1011_s25 }
 0x154   :  { %v741_v30 = vadd.f32 %v740_v29, %v712_v28 }
 0x155   :  { %v688_v40 = vpop.f32.mrf.mxu1 }
 0x156   :  { %788 = vrot.lane.b32.xlu1 %v741_v30, %s1012_s26 }
 0x157   :  { %v578_v33 = vpop.f32.mrf.mxu0 }
 0x158   :  { %v579_v34 = vadd.f32 %v578_v33, %v550_v32 }
 0x159   :  { %v714_v35 = vpop.f32.mrf.mxu2 }
 0x15a   :  { %v715_v36 = vadd.f32 %v714_v35, %v685_v31  ;;  %v743_v37 = vpop.f32.mrf.mxu3  ;;  %778 = vrot.lane.b32.xlu0 %v579_v34, %s1011_s25 }
 0x15c   :  { %v744_v39 = vadd.f32 %v743_v37, %v715_v36 }
 0x15d   :  { %v691_v46 = vpop.f32.mrf.mxu1 }
 0x15e   :  { %790 = vrot.lane.b32.xlu2 %v744_v39, %s1012_s26 }
 0x161   :  { %v717_v41 = vpop.f32.mrf.mxu2 }
 0x162   :  { %v718_v42 = vadd.f32 %v717_v41, %v688_v40  ;;  %v746_v44 = vpop.f32.mrf.mxu3 }
 0x164   :  { %v747_v45 = vadd.f32 %v746_v44, %v718_v42 }
 0x166   :  { %792 = vrot.lane.b32.xlu0 %v747_v45, %s1012_s26 }
 0x169   :  { %v720_v47 = vpop.f32.mrf.mxu2 }
 0x16a   :  { %v721_v48 = vadd.f32 %v720_v47, %v691_v46  ;;  %v749_v49 = vpop.f32.mrf.mxu3 }
 0x16c   :  { %v750_v51 = vadd.f32 %v749_v49, %v721_v48 }
 0x16e   :  { %794 = vrot.lane.b32.xlu1 %v750_v51, %s1012_s26 }
 0x17e   :  { %v757_v52 = vpop.permute.xlu2 %756 }
 0x17f   :  { %v801_v0 = vsel %vm800_vm0, %v1748_v38, %v757_v52 }
 0x196   :  { %v763_v53 = vpop.permute.xlu2 %762 }
 0x197   :  { %v804_v38 = vsel %vm800_vm0, %v1754_v56, %v763_v53 }
 0x19e   :  { %v759_v57 = vpop.permute.xlu0 %758 }
 0x19f   :  { %v802_v58 = vsel %vm800_vm0, %v1750_v43, %v759_v57 }
 0x1a6   :  { %v761_v54 = vpop.permute.xlu1 %760 }
 0x1a7   :  { %v803_v43 = vsel %vm800_vm0, %v1752_v50, %v761_v54 }
 0x1ac   :  { %v777_v55 = vpop.permute.xlu2 %776 }
 0x1ad   :  { %v808_v5 = vsel %vm805_vm2, %v803_v43, %v777_v55 }
 0x1b4   :  { %v773_v63 = vpop.permute.xlu0 %772 }
 0x1b5   :  { %v806_v1 = vsel %vm805_vm2, %v801_v0, %v773_v63 }
 0x1b8   :  { %v791_v60 = vpop.permute.xlu2 %790 }
 0x1bc   :  { %v775_v59 = vpop.permute.xlu1 %774 }
 0x1bd   :  { %v807_v61 = vsel %vm805_vm2, %v802_v58, %v775_v59 }
 0x1be   :  { %v812_v62 = vsel %vm810_vm1, %v807_v61, %v791_v60 }
 0x1bf   :  { %816 = vst [vmem:[#allocation2 + $0x8] sm:$0xff] %v812_v62 }
 0x1c8   :  { %v789_v2 = vpop.permute.xlu1 %788 }
 0x1c9   :  { %v811_v3 = vsel %vm810_vm1, %v806_v1, %v789_v2 }
 0x1ca   :  { %815 = vst [vmem:[#allocation2] sm:$0xff] %v811_v3 }
 0x1cc   :  { %v779_v4 = vpop.permute.xlu0 %778 }
 0x1cd   :  { %v809_v8 = vsel %vm805_vm2, %v804_v38, %v779_v4 }
 0x1d8   :  { %v793_v6 = vpop.permute.xlu0 %792 }
 0x1d9   :  { %v813_v7 = vsel %vm810_vm1, %v808_v5, %v793_v6 }
 0x1da   :  { %817 = vst [vmem:[#allocation2 + $0x10] sm:$0xff] %v813_v7 }
 0x1e0   :  { %v795_v50 = vpop.permute.xlu1 %794 }
 0x1e1   :  { %v814_v9 = vsel %vm810_vm1, %v809_v8, %v795_v50 }
 0x1e2   :  { %818 = vst [vmem:[#allocation2 + $0x18] sm:$0xff] %v814_v9 }
 0x1e3   :  { %831 = dma.vmem_to_hbm [thread:$0]  %s824_s28, 512, %s826_s3, [#allocation3], %s1014_s4, %s1014_s4, %s1015_s5  }
 0x1e4   :  { %999 = dma.done.wait [#allocation3], 512  }
 0x1e5   :  { %1000 = vsyncadd [#allocation3], 4294966784 }
 0x1e6   :  { %836 = vsyncpa [#allocation3], 1 }

</bundles_post_ra>
